<compile_context>
chip_gen: v6e
topology: v6e:2x2x1
jax: 0.10.0
libtpu: 0.0.40
codegen_flags: <defaults>
</compile_context>

<pallas_src>
import jax
import jax.numpy as jnp
from jax.experimental import pallas as pl
from jax.experimental.pallas import tpu as pltpu


def _round_up(x, m):
    return (x + m - 1) // m * m


def _kernel_with_emb(x_ref, w1_ref, b1_ref, w2_ref, b2_ref, out_ref, emb_ref):
    # layer1: Linear + ReLU  (Dropout == identity in eval mode)
    h = jnp.dot(x_ref[...], w1_ref[...], preferred_element_type=jnp.float32)
    h = h + b1_ref[...].astype(jnp.float32)          # broadcast [1, emb] over rows
    emb = jnp.maximum(h, 0.0)
    emb_ref[...] = emb.astype(emb_ref.dtype)

    # layer2: Linear + ReLU (f32 math, cast only at the final store)
    o = jnp.dot(emb, w2_ref[...].astype(jnp.float32),
                preferred_element_type=jnp.float32)
    o = o + b2_ref[...].astype(jnp.float32)
    out_ref[...] = jnp.maximum(o, 0.0).astype(out_ref.dtype)


def _kernel_score_only(x_ref, w1_ref, b1_ref, w2_ref, b2_ref, out_ref):
    # Same as above but the embedding is never written back to HBM.
    h = jnp.dot(x_ref[...], w1_ref[...], preferred_element_type=jnp.float32)
    h = h + b1_ref[...].astype(jnp.float32)
    emb = jnp.maximum(h, 0.0)

    o = jnp.dot(emb, w2_ref[...].astype(jnp.float32),
                preferred_element_type=jnp.float32)
    o = o + b2_ref[...].astype(jnp.float32)
    out_ref[...] = jnp.maximum(o, 0.0).astype(out_ref.dtype)


def semi_ad_net_forward(x, w1, b1, w2, b2, return_embedding=False,
                        block_rows=2048):
    """x: [N, input_dim]; w1: [input_dim, embSize]; b1: [1, embSize];
    w2: [embSize, num_classes]; b2: [1, num_classes]."""
    n, input_dim = x.shape
    emb_size = w1.shape[1]
    num_classes = w2.shape[1]

    # Row tile: as large as requested, multiple of 8 (f32 sublanes), never
    # wildly larger than the batch.  ~(block_n * input_dim * 4) bytes per
    # double-buffered input slab -> trivially fits VMEM on v5e/v6e/v7x.
    block_n = min(int(block_rows), _round_up(n, 8))
    block_n = max(8, (block_n // 8) * 8)
    grid = (pl.cdiv(n, block_n),)

    x_spec = pl.BlockSpec((block_n, input_dim), lambda i: (i, 0))
    w1_spec = pl.BlockSpec((input_dim, emb_size), lambda i: (0, 0))
    b1_spec = pl.BlockSpec((1, emb_size), lambda i: (0, 0))
    w2_spec = pl.BlockSpec((emb_size, num_classes), lambda i: (0, 0))
    b2_spec = pl.BlockSpec((1, num_classes), lambda i: (0, 0))
    out_spec = pl.BlockSpec((block_n, num_classes), lambda i: (i, 0))
    emb_spec = pl.BlockSpec((block_n, emb_size), lambda i: (i, 0))

    in_dt = jnp.dtype(x.dtype).itemsize
    out_dt = jnp.dtype(x.dtype).itemsize
    flops = 2 * n * (input_dim * emb_size + emb_size * num_classes)
    bytes_accessed = (n * input_dim * in_dt
                      + (input_dim * emb_size + emb_size
                         + emb_size * num_classes + num_classes) * in_dt
                      + n * num_classes * out_dt
                      + (n * emb_size * out_dt if return_embedding else 0))
    cost = pl.CostEstimate(flops=flops, transcendentals=0,
                           bytes_accessed=bytes_accessed)

    cparams = pltpu.CompilerParams(dimension_semantics=("parallel",))

    if return_embedding:
        out, emb = pl.pallas_call(
            _kernel_with_emb,
            out_shape=(
                jax.ShapeDtypeStruct((n, num_classes), x.dtype),
                jax.ShapeDtypeStruct((n, emb_size), x.dtype),
            ),
            grid=grid,
            in_specs=[x_spec, w1_spec, b1_spec, w2_spec, b2_spec],
            out_specs=(out_spec, emb_spec),
            compiler_params=cparams,
            cost_estimate=cost,
        )(x, w1, b1, w2, b2)
        return out, emb

    out = pl.pallas_call(
        _kernel_score_only,
        out_shape=jax.ShapeDtypeStruct((n, num_classes), x.dtype),
        grid=grid,
        in_specs=[x_spec, w1_spec, b1_spec, w2_spec, b2_spec],
        out_specs=out_spec,
        compiler_params=cparams,
        cost_estimate=cost,
    )(x, w1, b1, w2, b2)
    return out


def init_params(key, input_dim, emb_size=20, num_classes=1, dtype=jnp.float32):
    """Deterministic init mimicking nn.Linear default (uniform +/- 1/sqrt(fan_in))."""
    k1, k2, k3, k4 = jax.random.split(key, 4)
    lim1 = 1.0 / jnp.sqrt(jnp.array(input_dim, dtype))
    lim2 = 1.0 / jnp.sqrt(jnp.array(emb_size, dtype))
    w1 = jax.random.uniform(k1, (input_dim, emb_size), dtype, -lim1, lim1)
    b1 = jax.random.uniform(k2, (1, emb_size), dtype, -lim1, lim1)
    w2 = jax.random.uniform(k3, (emb_size, num_classes), dtype, -lim2, lim2)
    b2 = jax.random.uniform(k4, (1, num_classes), dtype, -lim2, lim2)
    return w1, b1, w2, b2


if __name__ == "__main__":
    key = jax.random.PRNGKey(0)
    kx, kp, kx2 = jax.random.split(key, 3)

    batch, input_dim, emb_size, num_classes = 8, 32, 20, 1
    x = jax.random.normal(kx, (batch, input_dim), jnp.float32)
    w1, b1, w2, b2 = init_params(kp, input_dim, emb_size, num_classes)

    # 1) Embedding-returning path (single partial tile).
    out, emb = semi_ad_net_forward(x, w1, b1, w2, b2, return_embedding=True)
    jax.block_until_ready((out, emb))
    emb_ref = jnp.maximum(x @ w1 + b1, 0.0)
    out_ref = jnp.maximum(emb_ref @ w2 + b2, 0.0)
    assert jnp.allclose(out, out_ref, atol=1e-5), "output mismatch"
    assert jnp.allclose(emb, emb_ref, atol=1e-5), "embedding mismatch"
    assert out.shape == (batch, num_classes) and emb.shape == (batch, emb_size)

    # 2) Score-only path, multi-tile grid with a partial last tile
    #    (emb never written back to HBM).
    n2 = 1030
    x2 = jax.random.normal(kx2, (n2, input_dim), jnp.float32)
    out2 = semi_ad_net_forward(x2, w1, b1, w2, b2,
                               return_embedding=False, block_rows=256)
    out2 = jax.block_until_ready(out2)
    emb2_ref = jnp.maximum(x2 @ w1 + b1, 0.0)
    out2_ref = jnp.maximum(emb2_ref @ w2 + b2, 0.0)
    assert out2.shape == (n2, num_classes)
    assert jnp.allclose(out2, out2_ref, atol=1e-4, rtol=1e-4), "tiled score mismatch"

    # 3) bf16 input path (halves HBM read bytes on v6e/v7x); math stays f32.
    xb, w1b, b1b, w2b, b2b = (a.astype(jnp.bfloat16)
                              for a in (x2, w1, b1, w2, b2))
    out_bf = semi_ad_net_forward(xb, w1b, b1b, w2b, b2b, block_rows=256)
    out_bf = jax.block_until_ready(out_bf)
    embb_ref = jnp.maximum(xb.astype(jnp.float32) @ w1b.astype(jnp.float32)
                           + b1b.astype(jnp.float32), 0.0)
    outb_ref = jnp.maximum(embb_ref @ w2b.astype(jnp.float32)
                           + b2b.astype(jnp.float32), 0.0)
    assert jnp.allclose(out_bf.astype(jnp.float32), outb_ref,
                        atol=5e-2, rtol=5e-2), "bf16 score mismatch"

    print("KERNEL_OK")
</pallas_src>

<mosaic_0001>
module attributes {stable_mosaic.version = 11 : i64} {
  func.func @_kernel_with_emb(%arg0: i32, %arg1: memref<8x32xf32, #tpu.memory_space<vmem>>, %arg2: memref<32x20xf32, #tpu.memory_space<vmem>>, %arg3: memref<1x20xf32, #tpu.memory_space<vmem>>, %arg4: memref<20x1xf32, #tpu.memory_space<vmem>>, %arg5: memref<1x1xf32, #tpu.memory_space<vmem>>, %arg6: memref<8x1xf32, #tpu.memory_space<vmem>>, %arg7: memref<8x20xf32, #tpu.memory_space<vmem>>) attributes {dimension_semantics = [#tpu.dimension_semantics<parallel>], iteration_bounds = array<i64: 1>, scalar_prefetch = 0 : i64, scratch_operands = 0 : i64, tpu.core_type = #tpu.core_type<tc>, window_params = [{transform_indices = @transform_0, window_bounds = array<i64: 8, 32>}, {pipeline_mode = #tpu.pipeline_mode<synchronous>, transform_indices = @transform_1, window_bounds = array<i64: 32, 20>}, {pipeline_mode = #tpu.pipeline_mode<synchronous>, transform_indices = @transform_2, window_bounds = array<i64: 1, 20>}, {pipeline_mode = #tpu.pipeline_mode<synchronous>, transform_indices = @transform_3, window_bounds = array<i64: 20, 1>}, {pipeline_mode = #tpu.pipeline_mode<synchronous>, transform_indices = @transform_4, window_bounds = array<i64: 1, 1>}, {transform_indices = @transform_5, window_bounds = array<i64: 8, 1>}, {transform_indices = @transform_6, window_bounds = array<i64: 8, 20>}]} {
    %c0 = arith.constant 0 : index
    %c0_0 = arith.constant 0 : index
    %0 = vector.load %arg1[%c0, %c0_0] : memref<8x32xf32, #tpu.memory_space<vmem>>, vector<8x32xf32>
    %c0_1 = arith.constant 0 : index
    %c0_2 = arith.constant 0 : index
    %1 = vector.load %arg2[%c0_1, %c0_2] : memref<32x20xf32, #tpu.memory_space<vmem>>, vector<32x20xf32>
    %cst = arith.constant dense<0.000000e+00> : vector<8x20xf32>
    %2 = tpu.matmul %0, %1, %cst {dimension_numbers = #tpu.dot_dimension_numbers<[1], [0], [0], [1], [0, 0, 1, 1], [], []>} : vector<8x32xf32>, vector<32x20xf32>, vector<8x20xf32> -> vector<8x20xf32>
    %c0_3 = arith.constant 0 : index
    %c0_4 = arith.constant 0 : index
    %3 = vector.load %arg3[%c0_3, %c0_4] : memref<1x20xf32, #tpu.memory_space<vmem>>, vector<1x20xf32>
    %4 = vector.broadcast %3 : vector<1x20xf32> to vector<8x20xf32>
    %5 = arith.addf %2, %4 : vector<8x20xf32>
    %cst_5 = arith.constant 0.000000e+00 : f32
    %6 = vector.broadcast %cst_5 : f32 to vector<8x20xf32>
    %7 = arith.maximumf %5, %6 : vector<8x20xf32>
    %c0_6 = arith.constant 0 : index
    %c0_7 = arith.constant 0 : index
    %8 = vector.load %arg7[%c0_6, %c0_7] : memref<8x20xf32, #tpu.memory_space<vmem>>, vector<8x20xf32>
    tpu.vector_store %arg7[%c0_6, %c0_7], %7 {strides = array<i32>} : memref<8x20xf32, #tpu.memory_space<vmem>>, vector<8x20xf32>,
    %c0_8 = arith.constant 0 : index
    %c0_9 = arith.constant 0 : index
    %9 = vector.load %arg4[%c0_8, %c0_9] : memref<20x1xf32, #tpu.memory_space<vmem>>, vector<20x1xf32>
    %cst_10 = arith.constant dense<0.000000e+00> : vector<8x1xf32>
    %10 = tpu.matmul %7, %9, %cst_10 {dimension_numbers = #tpu.dot_dimension_numbers<[1], [0], [0], [1], [0, 0, 1, 1], [], []>} : vector<8x20xf32>, vector<20x1xf32>, vector<8x1xf32> -> vector<8x1xf32>
    %c0_11 = arith.constant 0 : index
    %c0_12 = arith.constant 0 : index
    %11 = vector.load %arg5[%c0_11, %c0_12] : memref<1x1xf32, #tpu.memory_space<vmem>>, vector<1x1xf32>
    %12 = vector.broadcast %11 : vector<1x1xf32> to vector<8x1xf32>
    %13 = arith.addf %10, %12 : vector<8x1xf32>
    %cst_13 = arith.constant 0.000000e+00 : f32
    %14 = vector.broadcast %cst_13 : f32 to vector<8x1xf32>
    %15 = arith.maximumf %13, %14 : vector<8x1xf32>
    %c0_14 = arith.constant 0 : index
    %c0_15 = arith.constant 0 : index
    %16 = vector.load %arg6[%c0_14, %c0_15] : memref<8x1xf32, #tpu.memory_space<vmem>>, vector<8x1xf32>
    tpu.vector_store %arg6[%c0_14, %c0_15], %15 {strides = array<i32>} : memref<8x1xf32, #tpu.memory_space<vmem>>, vector<8x1xf32>,
    return
  }
  func.func @transform_0(%arg0: i32) -> (i32, i32) {
    %c0_i32 = arith.constant 0 : i32
    %c0_i32_0 = arith.constant 0 : i32
    return %arg0, %c0_i32 : i32, i32
  }
  func.func @transform_1(%arg0: i32) -> (i32, i32) {
    %c0_i32 = arith.constant 0 : i32
    %c0_i32_0 = arith.constant 0 : i32
    %c0_i32_1 = arith.constant 0 : i32
    return %c0_i32, %c0_i32_0 : i32, i32
  }
  func.func @transform_2(%arg0: i32) -> (i32, i32) {
    %c0_i32 = arith.constant 0 : i32
    %c0_i32_0 = arith.constant 0 : i32
    %c0_i32_1 = arith.constant 0 : i32
    return %c0_i32, %c0_i32_0 : i32, i32
  }
  func.func @transform_3(%arg0: i32) -> (i32, i32) {
    %c0_i32 = arith.constant 0 : i32
    %c0_i32_0 = arith.constant 0 : i32
    %c0_i32_1 = arith.constant 0 : i32
    return %c0_i32, %c0_i32_0 : i32, i32
  }
  func.func @transform_4(%arg0: i32) -> (i32, i32) {
    %c0_i32 = arith.constant 0 : i32
    %c0_i32_0 = arith.constant 0 : i32
    %c0_i32_1 = arith.constant 0 : i32
    return %c0_i32, %c0_i32_0 : i32, i32
  }
  func.func @transform_5(%arg0: i32) -> (i32, i32) {
    %c0_i32 = arith.constant 0 : i32
    %c0_i32_0 = arith.constant 0 : i32
    return %arg0, %c0_i32 : i32, i32
  }
  func.func @transform_6(%arg0: i32) -> (i32, i32) {
    %c0_i32 = arith.constant 0 : i32
    %c0_i32_0 = arith.constant 0 : i32
    return %arg0, %c0_i32 : i32, i32
  }
}

</mosaic_0001>

<bundles_post_ra>
// kernel: tpu_custom_call.1
= control target key start
LH: loop header
LB: loop body
LE: loop exit
PB: predicated region body
PF: predicated region fallthrough
CT: control target
= control target key end

     0   :  { %s355_s0 = inlined_call_operand.vmem [shape: f32[8,32], index: 0, kind: input, shape index: {}]   ;;  %s356_s1 = inlined_call_operand.vmem [shape: f32[32,20], index: 1, kind: input, shape index: {}]   ;;  %s357_s2 = inlined_call_operand.vmem [shape: f32[1,20], index: 2, kind: input, shape index: {}]   ;;  %s358_s3 = inlined_call_operand.vmem [shape: f32[20,1], index: 3, kind: input, shape index: {}]   ;;  %s359_s4 = inlined_call_operand.<no memory space> [shape: f32[1,1], index: 4, kind: input, shape index: {}]   ;;  %s360_s5 = inlined_call_operand.vmem [shape: f32[8,1], index: 5, kind: output, shape index: {0}]   ;;  %s361_s6 = inlined_call_operand.hbm [shape: f32[8,20], index: 6, kind: output, shape index: {1}]  }
   0x1   :  { %v12_v0 = vstv %s359_s4 }
   0x2   :  { %13 = vst [vmem:[#allocation2] sm:$0x1] %v12_v0 }
   0x3   :  { %v29_v1 = vld [vmem:[%s356_s1 + $0x18] sm:$0xff]  ;;  %v281_v2 = vmov 0.0   ;;  %v28_v3 = vld [vmem:[%s356_s1 + $0x10] sm:$0xff]  ;;  %vm282_vm0 = vmmov 0  }
   0x4   :  { %236 = vmatprep.subr.mxu0 %v281_v2  ;;  %244 = vmatprep.mubr.msk.f32.mxu0 %vm282_vm0, %v281_v2 }
   0x5   :  { %237 = vmatpush3.msra.mxu0 %v29_v1  ;;  %247 = vmatprep.subr.mxu1 %v281_v2 }
   0x6   :  { %14 = vsyncpa [#allocation4], 0  ;;  %238 = vmatprep.subr.mxu0 %v281_v2  ;;  %v27_v4 = vld [vmem:[%s356_s1 + $0x8] sm:$0xff]  ;;  %253 = vmatprep.mubr.msk.f32.mxu1 %vm282_vm0, %v281_v2  ;;  %v26_v5 = vld [vmem:[%s356_s1] sm:$0xff]  ;;  %vm37_vm1 = vcmask 261120   ;;  %vm127_vm2 = vcmask 1043456  }
   0x7   :  { %239 = vmatpush3.msra.mxu0 %v28_v3  ;;  %v25_v6 = vld [vmem:[%s355_s0] sm:$0xff]  ;;  %v116_v7 = vld [vmem:[%s358_s3 + $0x10] sm:$0xf]  ;;  %v115_v8 = vld [vmem:[%s358_s3 + $0x8] sm:$0xff]  ;;  %vm112_vm3 = vcmask 162816   ;;  %s283_s14 = smov [#allocation3]  }
   0x8   :  { %240 = vmatprep.subr.mxu0 %v281_v2  ;;  %248 = vmatpush3.msk.msra.mxu1 %vm127_vm2, %v116_v7  ;;  %v114_v9 = vld [vmem:[%s358_s3] sm:$0xff]  ;;  %s212_s15 = sshll.u32 %s283_s14, 4  ;;  %s213_s15 = int_to_ptr.vmem [resolvable:$true] %s212_s15 }
   0x9   :  { %241 = vmatpush3.msra.mxu0 %v27_v4  ;;  %249 = vmatprep.subr.mxu1 %v281_v2  ;;  %v222_v10 = vld [vmem:[%s357_s2] ss:$0 sm:$0xff]  ;;  %s259_s16 = scalar_lea.vmem %s213_s15, 128  ;;  %p264_p1 = scmp.lt.s32.totalorder %s213_s15, %s213_s15 }
   0xa   :  { %242 = vmatprep.subr.mxu0 %v281_v2  ;;  %250 = vmatpush3.msra.mxu1 %v115_v8  ;;  %p260_p0 = scmp.ne.s32.totalorder %s213_s15, %s259_s16  ;;  %p265_p2 = scmp.lt.s32.totalorder %s259_s16, %s259_s16 }
   0xb   :  { %243 = vmatpush3.msra.mxu0 %v26_v5  ;;  %251 = vmatprep.subr.mxu1 %v281_v2 }
   0xc   :  { %245 = vmatmul.mubr.msk.f32.vlgmr.msra.gmra.mxu0 %vm37_vm1, %v25_v6  ;;  %252 = vmatpush3.msra.mxu1 %v114_v9  ;;  %p266_p3 = por %p265_p2, %p264_p1 }
   0xe   :  { %p267_p4 = pnand %p266_p3, %p260_p0 }
  0xcc   :  { %v107_v11 = vpop.f32.mrf.mxu0 }
  0xcd   :  { %v108_v12 = vadd.f32 %v222_v10, %v107_v11 }
  0xce   :  { %v246_v13 = vpop.f32.mrf.mxu0 }
  0xcf   :  { %v111_v14 = vmax.f32 %v108_v12, 0.0 }
  0xd1   :  { %254 = vmatmul.mubr.msk.f32.vlgmr.msra.gmra.mxu1 %vm112_vm3, %v111_v14  ;;  %113 = vst.msk [vmem:[#allocation3] sm:$0xff] %vm112_vm3, %v111_v14 }
  0xd2   :  { %270 = shalt.err (!%p267_p4)
}
  0xd3   :  { %215 = dma.vmem_to_hbm [thread:$0]  %s213_s15, 128, %s361_s6, [#allocation4]   ;;  %v224_v15 = vld [vmem:[#allocation2] ss:$0 sm:$0xff]  ;;  %vm202_vm4 = vcmask 7168  }
 0x191   :  { %v197_v16 = vpop.f32.mrf.mxu1 }
 0x192   :  { %v198_v17 = vadd.f32 %v224_v15, %v197_v16 }
 0x193   :  { %v255_v18 = vpop.f32.mrf.mxu1 }
 0x194   :  { %v201_v19 = vmax.f32 %v198_v17, 0.0 }
 0x196   :  { %203 = vst.msk [vmem:[%s360_s5] sm:$0xff] %vm202_vm4, %v201_v19 }
 0x197   :  { %279 = dma.done.wait [#allocation4], 128  }
 0x198   :  { %280 = vsyncadd [#allocation4], 4294967168 }
 0x199   :  { %221 = vsyncpa [#allocation4], 1 }

</bundles_post_ra>
